<compile_context>
chip_gen: v6e
topology: v6e:2x2x1
jax: 0.10.0
libtpu: 0.0.40
codegen_flags: <defaults>
</compile_context>

<pallas_src>
import math

import jax
import jax.numpy as jnp
from jax.experimental import pallas as pl
from jax.experimental.pallas import tpu as pltpu


def _channel_merger_kernel(subject_ref, emb_t_ref, heads_ref, meg_ref, out_ref, w_ref):
    """One (batch b, time-tile t) grid step.

    subject_ref: (B,) int32 in SMEM (scalar prefetch; consumed only by the heads index_map)
    emb_t_ref:   (D, C)        bf16 pre-transposed Fourier embedding, batch-invariant
    heads_ref:   (1, chout, D) bf16 subject-gathered head for this batch element
    meg_ref:     (1, C, Tt)    MEG time tile (native activation dtype, ideally bf16)
    out_ref:     (1, chout, Tt)
    w_ref:       (chout, C)    VMEM scratch holding the softmax weights for this b
    """
    del subject_ref  # only used by the index_map

    # Weights are a function of (subject, positions) only -> compute once per batch
    # element (first time tile) and cache in VMEM scratch across the t axis.
    @pl.when(pl.program_id(1) == 0)
    def _():
        # scores[o, c] = sum_d heads[o, d] * emb[c, d] == heads @ emb_T  (bf16 MXU, f32 acc)
        scores = jnp.dot(heads_ref[0], emb_t_ref[...],
                         preferred_element_type=jnp.float32)          # (chout, C)
        # softmax over channels (dim=2 in the PyTorch code); score_offset == 0 in eval.
        m = jnp.max(scores, axis=-1, keepdims=True)
        e = jnp.exp(scores - m)
        s = jnp.sum(e, axis=-1, keepdims=True)
        inv_s = pl.reciprocal(s, approx=True)                          # EUP slot
        w_ref[...] = (e * inv_s).astype(w_ref.dtype)

    # out[o, t] = sum_c weights[o, c] * meg[c, t]   ('bct,boc->bot')
    # Pure streaming matmul: meg is used in its native dtype, f32 accumulation on the MXU.
    out = jnp.dot(w_ref[...], meg_ref[0], preferred_element_type=jnp.float32)
    out_ref[0] = out.astype(out_ref.dtype)


def _fourier_phases(positions, pos_dim, margin=0.2):
    """Batch-independent Fourier phase matrix loc (C, pos_dim // 2).

    FourierEmb: emb = concat([cos(loc), sin(loc)], -1).
    """
    C = positions.shape[0]
    n_freqs = int(round((pos_dim // 2) ** 0.5))
    assert n_freqs * n_freqs * 2 == pos_dim
    freqs = jnp.arange(n_freqs, dtype=jnp.float32)
    width = 1.0 + 2.0 * margin
    pos = positions.astype(jnp.float32) + margin                       # (C, 2)
    p_x = 2.0 * math.pi * freqs[:, None] / width                       # (n_freqs, 1)
    p_y = 2.0 * math.pi * freqs / width                                # (n_freqs,)
    loc = (pos[:, 0][:, None, None] * p_x[None, :, :]
           + pos[:, 1][:, None, None] * p_y[None, None, :])            # (C, n_freqs, n_freqs)
    return loc.reshape(C, n_freqs * n_freqs)                           # (C, pos_dim // 2)


def _pick_vmem_limit_bytes(C, chout, tile_t, itemsize):
    """Generation-aware VMEM limit: generous on v5e/v6e (128 MiB), safe on v7x (64 MiB)."""
    # double-buffered meg + out tiles, plus slack for emb_T / heads / weights scratch
    tiles = 2 * (C + chout) * tile_t * itemsize
    want = max(32 << 20, 3 * tiles)
    try:
        cap = int(getattr(pltpu.get_tpu_info(), "vmem_capacity_bytes", 64 << 20))
    except Exception:
        cap = 64 << 20
    return int(min(want, (cap * 3) // 4))


def channel_merger_forward(meg, subject, positions, heads, pos_dim, margin=0.2,
                           tile_t=2048):
    B, C, T = meg.shape
    n_subjects, chout, D = heads.shape
    assert D == pos_dim

    # Glue: precompute the (D, C) transposed embedding once (cos/sin outside the kernel);
    # pre-cast the tiny scores-matmul operands to bf16 (f32 accumulation happens in-kernel).
    loc = _fourier_phases(positions, pos_dim, margin)                  # (C, D // 2)
    emb_t = jnp.concatenate([jnp.cos(loc), jnp.sin(loc)], axis=-1).T   # (D, C)
    emb_t = emb_t.astype(jnp.bfloat16)
    heads_b = heads.astype(jnp.bfloat16)

    subject = subject.astype(jnp.int32)

    # meg is consumed in its native dtype (bf16 recommended upstream); no standalone cast
    # pass is added here because it would cost an extra HBM round-trip.
    mix_dtype = meg.dtype
    out_dtype = meg.dtype

    # Time tiling: multiple of 128 (lane-dense stores) unless T itself is small,
    # in which case the block spans the full T dim (always legal).
    if T <= tile_t:
        tile_t = T
    else:
        tile_t = max(128, (tile_t // 128) * 128)
    n_t = pl.cdiv(T, tile_t)

    vmem_limit = _pick_vmem_limit_bytes(C, chout, tile_t, jnp.dtype(mix_dtype).itemsize)

    return pl.pallas_call(
        _channel_merger_kernel,
        out_shape=jax.ShapeDtypeStruct((B, chout, T), out_dtype),
        grid_spec=pltpu.PrefetchScalarGridSpec(
            num_scalar_prefetch=1,                                      # subject -> SMEM
            grid=(B, n_t),
            in_specs=[
                # shared, batch-invariant embedding (DMA'd once; block index never changes)
                pl.BlockSpec((D, C), lambda b, t, subj: (0, 0)),
                # per-sample head, gathered straight from the parameter via scalar prefetch
                pl.BlockSpec((1, chout, D), lambda b, t, subj: (subj[b], 0, 0)),
                # MEG time tile
                pl.BlockSpec((1, C, tile_t), lambda b, t, subj: (b, 0, t)),
            ],
            out_specs=pl.BlockSpec((1, chout, tile_t), lambda b, t, subj: (b, 0, t)),
            scratch_shapes=[pltpu.VMEM((chout, C), mix_dtype)],         # cached softmax weights
        ),
        compiler_params=pltpu.CompilerParams(
            # t must be "arbitrary": the pl.when(t == 0) weights-cache requires each
            # core's t-range to start at 0 (v7x dual-TC shards on the B axis only).
            dimension_semantics=("parallel", "arbitrary"),
            vmem_limit_bytes=vmem_limit,
        ),
    )(subject, emb_t, heads_b, meg)


def _reference(meg, subject, positions, heads, pos_dim, margin=0.2):
    """Plain-JAX f32 reference mirroring the PyTorch forward (eval mode)."""
    loc = _fourier_phases(positions, pos_dim, margin)                   # (C, D//2)
    emb = jnp.concatenate([jnp.cos(loc), jnp.sin(loc)], axis=-1)        # (C, D)
    h = heads[subject]                                                  # (B, chout, D)
    scores = jnp.einsum('cd,bod->boc', emb, h)                          # (B, chout, C)
    weights = jax.nn.softmax(scores, axis=2)
    return jnp.einsum('bct,boc->bot', meg, weights)                     # (B, chout, T)


if __name__ == "__main__":
    B, C, T = 2, 16, 8
    chout, pos_dim, n_subjects = 8, 32, 4        # pos_dim = 2 * n_freqs**2, n_freqs = 4

    key = jax.random.PRNGKey(0)
    k_pos, k_heads, k_meg, k_subj = jax.random.split(key, 4)

    positions = jax.random.uniform(k_pos, (C, 2), dtype=jnp.float32)    # channel layout in [0,1]^2
    heads = (jax.random.normal(k_heads, (n_subjects, chout, pos_dim), dtype=jnp.float32)
             / math.sqrt(pos_dim))                                      # nn.Parameter init
    # Per the perf review: carry the big activation tensor in bf16 end-to-end.
    meg = jax.random.normal(k_meg, (B, C, T), dtype=jnp.float32).astype(jnp.bfloat16)
    subject = jax.random.randint(k_subj, (B,), 0, n_subjects, dtype=jnp.int32)

    out = channel_merger_forward(meg, subject, positions, heads, pos_dim)
    out = jax.block_until_ready(out)

    ref = _reference(meg.astype(jnp.float32), subject, positions, heads, pos_dim)
    assert out.shape == (B, chout, T)
    assert out.dtype == meg.dtype
    # bf16 scores/weights/mix + approx reciprocal + bf16 output -> loosened tolerance
    # vs the f32 reference (eval-mode only; see correctness notes).
    assert jnp.allclose(out.astype(jnp.float32), ref, atol=3e-2, rtol=3e-2), \
        "mismatch vs plain-JAX reference"

    print("KERNEL_OK")
</pallas_src>

<mosaic_0001>
module attributes {stable_mosaic.version = 11 : i64} {
  func.func @_channel_merger_kernel(%arg0: i32, %arg1: i32, %arg2: memref<2xi32, #tpu.memory_space<smem>>, %arg3: memref<32x16xbf16, #tpu.memory_space<vmem>>, %arg4: memref<1x8x32xbf16, #tpu.memory_space<vmem>>, %arg5: memref<1x16x8xbf16, #tpu.memory_space<vmem>>, %arg6: memref<1x8x8xbf16, #tpu.memory_space<vmem>>, %arg7: memref<8x16xbf16, #tpu.memory_space<vmem>>) attributes {dimension_semantics = [#tpu.dimension_semantics<parallel>, #tpu.dimension_semantics<arbitrary>], iteration_bounds = array<i64: 2, 1>, scalar_prefetch = 1 : i64, scratch_operands = 1 : i64, tpu.core_type = #tpu.core_type<tc>, window_params = [{pipeline_mode = #tpu.pipeline_mode<synchronous>, transform_indices = @transform_0, window_bounds = array<i64: 32, 16>}, {transform_indices = @transform_1, window_bounds = array<i64: 1, 8, 32>}, {transform_indices = @transform_2, window_bounds = array<i64: 1, 16, 8>}, {transform_indices = @transform_3, window_bounds = array<i64: 1, 8, 8>}]} {
    %c0_i32 = arith.constant 0 : i32
    %0 = arith.cmpi eq, %arg1, %c0_i32 : i32
    %1 = arith.extui %0 : i1 to i32
    %c0_i32_0 = arith.constant 0 : i32
    %2 = arith.cmpi ne, %1, %c0_i32_0 : i32
    scf.if %2 {
      %c0_8 = arith.constant 0 : index
      %c0_9 = arith.constant 0 : index
      %c0_10 = arith.constant 0 : index
      %11 = vector.load %arg4[%c0_8, %c0_9, %c0_10] : memref<1x8x32xbf16, #tpu.memory_space<vmem>>, vector<1x8x32xbf16>
      %12 = vector.shape_cast %11 : vector<1x8x32xbf16> to vector<8x32xbf16>
      %c0_11 = arith.constant 0 : index
      %c0_12 = arith.constant 0 : index
      %13 = vector.load %arg3[%c0_11, %c0_12] : memref<32x16xbf16, #tpu.memory_space<vmem>>, vector<32x16xbf16>
      %cst_13 = arith.constant dense<0.000000e+00> : vector<8x16xf32>
      %14 = tpu.matmul %12, %13, %cst_13 {dimension_numbers = #tpu.dot_dimension_numbers<[1], [0], [0], [1], [0, 0, 1, 1], [], []>} : vector<8x32xbf16>, vector<32x16xbf16>, vector<8x16xf32> -> vector<8x16xf32>
      %cst_14 = arith.constant dense<0xFF800000> : vector<8xf32>
      %15 = vector.multi_reduction <maximumf>, %14, %cst_14 [1] : vector<8x16xf32> to vector<8xf32>
      %16 = vector.shape_cast %15 : vector<8xf32> to vector<8x1xf32>
      %17 = vector.broadcast %16 : vector<8x1xf32> to vector<8x16xf32>
      %18 = arith.subf %14, %17 : vector<8x16xf32>
      %19 = math.exp %18 : vector<8x16xf32>
      %cst_15 = arith.constant dense<0.000000e+00> : vector<8xf32>
      %20 = vector.multi_reduction <add>, %19, %cst_15 [1] : vector<8x16xf32> to vector<8xf32>
      %21 = vector.shape_cast %20 : vector<8xf32> to vector<8x1xf32>
      %22 = tpu.reciprocal %21 {approx = true} : vector<8x1xf32> -> vector<8x1xf32>
      %23 = vector.broadcast %22 : vector<8x1xf32> to vector<8x16xf32>
      %24 = arith.mulf %19, %23 : vector<8x16xf32>
      %25 = arith.truncf %24 : vector<8x16xf32> to vector<8x16xbf16>
      %c0_16 = arith.constant 0 : index
      %c0_17 = arith.constant 0 : index
      %26 = vector.load %arg7[%c0_16, %c0_17] : memref<8x16xbf16, #tpu.memory_space<vmem>>, vector<8x16xbf16>
      tpu.vector_store %arg7[%c0_16, %c0_17], %25 {strides = array<i32>} : memref<8x16xbf16, #tpu.memory_space<vmem>>, vector<8x16xbf16>,
    } else {
    }
    %c0 = arith.constant 0 : index
    %c0_1 = arith.constant 0 : index
    %3 = vector.load %arg7[%c0, %c0_1] : memref<8x16xbf16, #tpu.memory_space<vmem>>, vector<8x16xbf16>
    %c0_2 = arith.constant 0 : index
    %c0_3 = arith.constant 0 : index
    %c0_4 = arith.constant 0 : index
    %4 = vector.load %arg5[%c0_2, %c0_3, %c0_4] : memref<1x16x8xbf16, #tpu.memory_space<vmem>>, vector<1x16x8xbf16>
    %5 = vector.shape_cast %4 : vector<1x16x8xbf16> to vector<16x8xbf16>
    %cst = arith.constant dense<0.000000e+00> : vector<8x8xf32>
    %6 = tpu.matmul %3, %5, %cst {dimension_numbers = #tpu.dot_dimension_numbers<[1], [0], [0], [1], [0, 0, 1, 1], [], []>} : vector<8x16xbf16>, vector<16x8xbf16>, vector<8x8xf32> -> vector<8x8xf32>
    %7 = arith.truncf %6 : vector<8x8xf32> to vector<8x8xbf16>
    %c0_5 = arith.constant 0 : index
    %c0_6 = arith.constant 0 : index
    %c0_7 = arith.constant 0 : index
    %8 = vector.load %arg6[%c0_5, %c0_6, %c0_7] : memref<1x8x8xbf16, #tpu.memory_space<vmem>>, vector<1x8x8xbf16>
    %9 = vector.shape_cast %8 : vector<1x8x8xbf16> to vector<8x8xbf16>
    %10 = vector.shape_cast %7 : vector<8x8xbf16> to vector<1x8x8xbf16>
    tpu.vector_store %arg6[%c0_5, %c0_6, %c0_7], %10 {strides = array<i32>} : memref<1x8x8xbf16, #tpu.memory_space<vmem>>, vector<1x8x8xbf16>,
    return
  }
  func.func @transform_0(%arg0: i32, %arg1: i32, %arg2: memref<2xi32, #tpu.memory_space<smem>>) -> (i32, i32) {
    %c0_i32 = arith.constant 0 : i32
    %c0_i32_0 = arith.constant 0 : i32
    %c0_i32_1 = arith.constant 0 : i32
    return %c0_i32, %c0_i32_0 : i32, i32
  }
  func.func @transform_1(%arg0: i32, %arg1: i32, %arg2: memref<2xi32, #tpu.memory_space<smem>>) -> (i32, i32, i32) {
    %0 = arith.index_cast %arg0 : i32 to index
    %1 = memref.load %arg2[%0] : memref<2xi32, #tpu.memory_space<smem>>
    %c0_i32 = arith.constant 0 : i32
    %c0_i32_0 = arith.constant 0 : i32
    %c0_i32_1 = arith.constant 0 : i32
    return %1, %c0_i32, %c0_i32_0 : i32, i32, i32
  }
  func.func @transform_2(%arg0: i32, %arg1: i32, %arg2: memref<2xi32, #tpu.memory_space<smem>>) -> (i32, i32, i32) {
    %c0_i32 = arith.constant 0 : i32
    %c0_i32_0 = arith.constant 0 : i32
    return %arg0, %c0_i32, %arg1 : i32, i32, i32
  }
  func.func @transform_3(%arg0: i32, %arg1: i32, %arg2: memref<2xi32, #tpu.memory_space<smem>>) -> (i32, i32, i32) {
    %c0_i32 = arith.constant 0 : i32
    %c0_i32_0 = arith.constant 0 : i32
    return %arg0, %c0_i32, %arg1 : i32, i32, i32
  }
}

</mosaic_0001>

<bundles_post_ra>
// kernel: tpu_custom_call.1
= control target key start
LH: loop header
LB: loop body
LE: loop exit
PB: predicated region body
PF: predicated region fallthrough
CT: control target
= control target key end

     0   :  { %s814_s0 = inlined_call_operand.vmem [shape: s32[2], index: 0, kind: input, shape index: {}]   ;;  %s815_s1 = inlined_call_operand.vmem [shape: bf16[32,16], index: 1, kind: input, shape index: {}]   ;;  %s816_s2 = inlined_call_operand.vmem [shape: bf16[4,8,32], index: 2, kind: input, shape index: {}]   ;;  %s817_s3 = inlined_call_operand.vmem [shape: bf16[2,16,8], index: 3, kind: input, shape index: {}]   ;;  %s818_s4 = inlined_call_operand.hbm [shape: bf16[2,8,8], index: 4, kind: output, shape index: {}]  }
   0x1   :  { %s9_s17 = sshll.u32 %s814_s0, 4  ;;  %s10_s17 = int_to_ptr.vmem [resolvable:$true] %s9_s17 }
   0x2   :  { %s566_s18 = scalar_lea.vmem %s10_s17, 16  ;;  %p571_p1 = scmp.lt.s32.totalorder %s10_s17, %s10_s17 }
   0x3   :  { %p567_p0 = scmp.ne.s32.totalorder %s10_s17, %s566_s18  ;;  %p572_p2 = scmp.lt.s32.totalorder %s566_s18, %s566_s18 }
   0x5   :  { %p573_p3 = por %p572_p2, %p571_p1 }
   0x7   :  { %p574_p4 = pnand %p573_p3, %p567_p0 }
   0x9   :  { %577 = shalt.err (!%p574_p4)  }
   0xa   :  { %s658_s19 = smov [#allocation4]  }
   0xb   :  { %12 = dma.vmem_to_smem %s10_s17, 16, %s658_s19, [#allocation3] }
   0xc   :  { %628 = dma.done.wait [#allocation3], 16 }
   0xd   :  { %629 = vsyncadd [#allocation3], 4294967280 }
   0xe   :  { %14 = sfence }
   0xf   :  { %15 = vsyncpa [#allocation6], 0 }
  0x10   :  { %17 = vsyncpa [#allocation6 + $0x1], 0  ;;  %s690_s20 = smov 0   ;;  %s692_s21 = smov 0  }
  0x11   :  { %s694_s0 = smov 0   ;;  %s696_s22 = smov 0  }
  0x12   :  { %s698_s23 = smov 0   ;;  %s700_s24 = smov 0  }
  0x13 LB: > { %s463_s25 = sadd.s32 4294967295, %s656_s24   ;;  %s464_s26 = sadd.s32 4294967294, %s656_s24   ;;  %s656_s24 = sphi %s700_s24, %s23_s24   ;;  %s652_s23 = sphi %s698_s23, %s825_s23   ;;  %s648_s22 = sphi %s696_s22, %s824_s22   ;;  %s644_s0 = sphi %s694_s0, %s823_s0   ;;  %s640_s21 = sphi %s692_s21, %s822_s21   ;;  %s636_s20 = sphi %s690_s20, %s821_s20  }
  0x14   : > { %s35_s27 = sadd.s32 1, %s652_s23  ;;  %s121_s28 = sadd.s32 1, %s644_s0 }
  0x15   : > { %p37_p5 = scmp.ge.s32.totalorder %s35_s27, 2  ;;  %p131_p6 = scmp.ne.s32.totalorder %s644_s0, %s640_s21 }
  0x16   : > { %p132_p7 = scmp.eq.s32.totalorder %s463_s25, 1  ;;  %p137_p8 = scmp.ne.s32.totalorder %s640_s21, %s636_s20 }
  0x17   : > { %s827_s27 = smov (%p37_p5, %s35_s27), 0  ;;  %p138_p10 = scmp.eq.s32.totalorder %s464_s26, 1 }
  0x18   : > { %p730_p9 = por %p132_p7, %p131_p6  ;;  %s116_s30 = ssub.s32 %s652_s23, %s827_s27 }
  0x19   : > { %p467_p11 = scmp.ge.s32.totalorder %s656_s24, 1  ;;  %p119_p12 = scmp.eq.s32.totalorder %s116_s30, 0 }
  0x1a   : > { %p737_p13 = por %p138_p10, %p137_p8  ;;  %p179_p0 = scmp.lt.s32.totalorder %s656_s24, 3 }
  0x1b   : > { %s743_s6 = scalar_select %p119_p12, %s644_s0, %s121_s28  }
  0x1c   : > { %p180_p1 = pnand %p467_p11, %p179_p0 }
  0x1d   : > { %s211_s11 = sld [smem:[#allocation4 + %s648_s22]] (!%p180_p1)  ;;  %p217_p3 = scmp.lt.s32.totalorder (!%p180_p1), %s648_s22, 1 }
  0x1e   : > { %183 = sbr.rel (%p180_p1) target bundleno = 768 (0x300), region = 32  ;;  %s208_s26 = sand.u32 (!%p180_p1), 1, %s640_s21  }
  0x1f   : > { %s468_s28 = sshll.u32 (!%p180_p1), %s208_s26, 2  ;;  %s478_s30 = sshll.u32 (!%p180_p1), %s648_s22, 6 }
  0x20   : > { %s210_s7 = scalar_lea.vmem (!%p180_p1), [#allocation5], %s468_s28  ;;  %s661_s13 = smov (!%p180_p1), [#allocation5]  }
  0x21   : > { %s377_s8 = sshll.u32 (!%p180_p1), %s210_s7, 4  ;;  %s582_s14 = sshll.u32 (!%p180_p1), %s661_s13, 4  ;;  %s770_s8 = int_to_ptr.vmem [resolvable:$true] %s377_s8  ;;  %s583_s14 = int_to_ptr.vmem [resolvable:$false] %s582_s14 }
  0x22   : > { %p585_p7 = scmp.lt.s32.totalorder (!%p180_p1), %s770_s8, %s583_s14 }
  0x23   : > { %v559_v0 = vld [vmem:[%s815_s1 + $0x8] sm:$0xff]   ;;  %v659_v1 = vmov 0.0   ;;  %v560_v2 = vld [vmem:[%s815_s1] sm:$0xff]   ;;  %vm660_vm0 = vmmov 0   ;;  %p212_p2 = scmp.lt.s32.totalorder %s211_s11, 3  ;;  %vm247_vm1 = vcmask 261120  }
  0x24   : > { %487 = vmatprep.subr.bf16.mxu0 %v659_v1  ;;  %495 = vmatprep.subr.bf16.mxu1 %v659_v1  ;;  %vm291_vm2 = vcmask 130048   ;;  %s218_s16 = scalar_select %p217_p3, %s648_s22, 1  ;;  %vm304_vm3 = vcmask 125952   ;;  %vm360_vm4 = vcmask 60416  }
  0x25   : > { %488 = vmatpush3.bf16.msra.mxu0 %v559_v0  ;;  %491 = vmatprep.mubr.msk.bf16.mxu0 %vm660_vm0, %v659_v1  ;;  %s829_s11 = smov (!%p212_p2, %s211_s11), 3  ;;  %s578_s22 = scalar_lea.vmem %s770_s8, 64 }
  0x26   : > { %489 = vmatprep.subr.bf16.mxu0 %v659_v1  ;;  %497 = vmatprep.mubr.msk.bf16.mxu1 %vm660_vm0, %v659_v1  ;;  %s469_s12 = sshll.u32 %s829_s11, 2  ;;  %s481_s17 = sshll.u32 %s218_s16, 3 }
  0x27   : > { %s215_s15 = scalar_lea.vmem %s816_s2, %s469_s12  ;;  %s224_s25 = scalar_lea.vmem %s817_s3, %s481_s17 }
  0x28   : > { %v230_v3 = vld [vmem:[%s215_s15] sm:$0xf]  ;;  %s768_s11 = scalar_lea.hbm %s818_s4, %s478_s30  ;;  %s363_s12 = scalar_lea.sflag [#allocation6], %s208_s26 }
  0x29   : > { %490 = vmatpush3.bf16.msra.mxu0 %v560_v2  ;;  %v561_v14 = vld [vmem:[%s224_s25] sm:$0xff]   ;;  %p579_p4 = scmp.ne.s32.totalorder %s770_s8, %s578_s22  ;;  %s584_s15 = scalar_lea.vmem %s583_s14, 128 }
  0x2a   : > { %496 = vmatpush3.bf16.msra.mxu1 %v561_v14  ;;  %p586_p8 = scmp.lt.s32.totalorder %s584_s15, %s578_s22 }
  0x2b   : > { %p580_p5 = pnand %p579_p4, %p730_p9 }
  0x2c   : > { %492 = vmatmul.mubr.msk.bf16.vlgmr.msra.gmra.mxu0 %vm247_vm1, %v230_v3  ;;  %p587_p10 = por %p586_p8, %p585_p7 }
  0x2d   : > { %p581_p6 = pneg %p580_p5 }
  0x2f   : > { %p588_p11 = pnand %p587_p10, %p581_p6 }
  0xec   : > { %v285_v4 = vpop.f32.mrf.mxu0 }
  0xed   : > { %v292_v5 = vsel %vm291_vm2, %v285_v4, -inf }
  0xee   : > { %293 = vmax.xlane.f32.xlu0 %v292_v5  ;;  %v493_v6 = vpop.f32.mrf.mxu0 }
  0xf0   : > { %v288_v7 = vpop.f32.mrf.mxu0 }
  0xf2   : > { %v494_v8 = vpop.f32.mrf.mxu0 }
 0x177   : > { %v294_v9 = vpop.xlane.xlu0 %293 }
 0x178   : > { %v295_v10 = vsub.f32 %v285_v4, %v294_v9 }
 0x17a   : > { %v296_v11 = vmul.f32 1.442695, %v295_v10 }
 0x17c   : > { %562 = vpow2.f32 %v296_v11 }
 0x189   : > { %v563_v12 = vpop.eup %562 }
 0x18a   : > { %v298_v13 = vsel %vm291_vm2, %v563_v12, 0.0 }
 0x18b   : > { %299 = vadd.xlane.f32.xlu0 %v298_v13 }
 0x214   : > { %v300_v15 = vpop.xlane.xlu0 %299 }
 0x215   : > { %564 = vrcp.f32 %v300_v15 }
 0x222   : > { %v565_v16 = vpop.eup %564 }
 0x223   : > { %v302_v17 = vmul.f32 %v565_v16, %v563_v12 }
 0x225   : > { %v303_v18 = vpack.c.bf16 %v302_v17, %v302_v17 }
 0x227   : > { %305 = vst.msk [vmem:[#allocation2] sm:$0xf] %vm304_vm3, %v303_v18 }
 0x22e   : > { %v306_v19 = vld [vmem:[#allocation2] sm:$0xf] }
 0x22f   : > { %498 = vmatmul.mubr.msk.bf16.vlgmr.msra.gmra.mxu1 %vm291_vm2, %v306_v19 }
 0x2ef   : > { %v353_v20 = vpop.f32.mrf.mxu1 }
 0x2f0   : > { %v359_v21 = vpack.c.bf16 %v353_v20, %v353_v20 }
 0x2f1   : > { %v499_v22 = vpop.f32.mrf.mxu1 }
 0x2f2   : > { %361 = vst.msk [vmem:[%s210_s7] sm:$0xf] %vm360_vm4, %v359_v21 }
 0x2f3   : > { %v356_v23 = vpop.f32.mrf.mxu1 }
 0x2f4   : > { %591 = shalt.err (!%p588_p11)
}
 0x2f5   : > { %s592_s16 = scalar_lea.hbm %s768_s11, 64  ;;  %s596_s19 = scalar_lea.hbm %s818_s4, 128 }
 0x2f6   : > { %p593_p12 = scmp.ne.s32.totalorder %s768_s11, %s592_s16  ;;  %p597_p2 = scmp.lt.s32.totalorder %s768_s11, %s818_s4 }
 0x2f7   : > { %p598_p3 = scmp.lt.s32.totalorder %s596_s19, %s592_s16 }
 0x2f8   : > { %p594_p0 = pnand %p593_p12, %p730_p9 }
 0x2f9   : > { %p599_p4 = por %p598_p3, %p597_p2 }
 0x2fa   : > { %p595_p1 = pneg %p594_p0 }
 0x2fc   : > { %p600_p5 = pnand %p599_p4, %p595_p1 }
 0x2fe   : > { %603 = shalt.err (!%p600_p5)
}
 0x2ff   : > { %501 = dma.vmem_to_hbm [thread:$0]  (%p730_p9), %s770_s8, 64, %s768_s11, %s363_s12   ;;  %v500_v24 = vpop.f32.mrf.mxu1 }
 0x300 PF: > { %p507_p6 = scmp.ge.s32.totalorder %s656_s24, 2  ;;  %s389_s28 = sand.u32 1, %s636_s20  }
 0x301   : > { %s390_s30 = scalar_lea.sflag [#allocation6], %s389_s28 }
 0x302   : > { %p504_p7 = pnand %p507_p6, %p737_p13 }
 0x304   : > { %p505_p8 = pneg %p504_p7 }
 0x306   : > { %631 = dma.done.wait (%p505_p8), %s390_s30, 64  }
 0x307   : > { %633 = vsyncadd (%p505_p8), %s390_s30, 4294967232  ;;  %s23_s24 = sadd.s32 1, %s656_s24   ;;  %s821_s20 = smov %s640_s21 }
 0x308   : > { %p20_p10 = scmp.ge.s32.totalorder %s23_s24, 4   ;;  %s822_s21 = smov %s644_s0 }
 0x309   : > { %s823_s0 = smov %s743_s6  ;;  %s824_s22 = smov %s652_s23 }
 0x30a   : > { %s825_s23 = smov %s827_s27  ;;  %22 = sbr.rel (!%p20_p10) target bundleno = 19 (0x13), region = 74 }
 0x30f   :  { %395 = vsyncpa [#allocation6], 1 }
 0x310   :  { %397 = vsyncpa [#allocation6 + $0x1], 1 }

</bundles_post_ra>
